<compile_context>
chip_gen: v5e
topology: v5e:2x2
jax: 0.10.0
libtpu: 0.0.40
codegen_flags: <defaults>
</compile_context>

<pallas_src>
import functools

import jax
import jax.numpy as jnp
from jax.experimental import pallas as pl
from jax.experimental.pallas import tpu as pltpu


def _confidence_loss_kernel(p_ref, t_ref, out_ref, *, obj_coef, noobj_coef,
                            bn, n_total, needs_mask):
    # p_ref / t_ref: channel-14 tile for this chunk, either (bn, H*W) (lane-dense
    # path) or (bn, 1, H, W) (fallback).  out_ref: (1, 1) SMEM partial sum.
    t = t_ref[...].astype(jnp.float32)
    p = p_ref[...].astype(jnp.float32)

    # Exact identity sigmoid(x) = 0.5*tanh(0.5*x) + 0.5  ->  one EUP push per
    # sigmoid instead of exp+divide.
    sig_diff = 0.5 * (jnp.tanh(0.5 * t) - jnp.tanh(0.5 * p))
    diff = t - p
    loss = (obj_coef * t * (sig_diff * sig_diff)
            + noobj_coef * (1.0 - t) * (diff * diff))

    if needs_mask:
        # cdiv grid: zero out rows past the true batch size in the last chunk.
        row = (pl.program_id(0) * bn
               + jax.lax.broadcasted_iota(jnp.int32, loss.shape, 0))
        loss = jnp.where(row < n_total, loss, 0.0)

    # Single fused reduction per (large) chunk; partials summed in JAX.
    out_ref[0, 0] = jnp.sum(loss)


def confidence_loss(prediction, target, coord_coef=5, noobj_coef=0.5,
                    obj_coef=5, cls_coef=1.0):
    """prediction, target: (N, C, H, W) with C >= 15. Returns scalar float32."""
    del coord_coef, cls_coef  # unused in the reference forward (same as PyTorch)
    # TODO(synk): the PyTorch module's periodic print() logging side effect
    # (print_counter state) is dropped.
    assert prediction.shape == target.shape
    N, C, H, W = prediction.shape
    assert C >= 15, "channel 14 must exist"

    HW = H * W
    itemsize = jnp.dtype(prediction.dtype).itemsize
    n_elems = N * HW

    lane_dense = (HW % 128 == 0)
    if lane_dense:
        # Free metadata-only view of the contiguous NCHW buffer; channel 14
        # occupies columns [14*HW, 15*HW), selected purely by the BlockSpec.
        pred_v = prediction.reshape(N, C * HW)
        tgt_v = target.reshape(N, C * HW)
        row_bytes = HW * itemsize                       # dense rows, no padding
    else:
        # Fallback: keep 4-D blocks covering full (H, W); account for the
        # (8, 128) lane/sublane padding of the VMEM tile when budgeting.
        pred_v = prediction
        tgt_v = target
        row_bytes = (pl.cdiv(H, 8) * 8) * (pl.cdiv(W, 128) * 128) * itemsize

    # ~6 MiB per input buffer (padded) => 2 inputs x 2 pipeline buffers <= 24 MiB.
    budget_bytes = 6 * 1024 * 1024
    budget_rows = max(1, budget_bytes // max(row_bytes, 1))
    bn = min(N, budget_rows)
    if N >= 16:
        # Keep >=2 chunks so dimension_semantics=("parallel",) can spread the
        # grid across both v7x TensorCores (neutral on single-TC v5e/v6e).
        bn = min(bn, pl.cdiv(N, 2))
    if bn < N and lane_dense:
        # Second-to-last block dim must be a multiple of 8 (or the full extent).
        bn = max(8, (bn // 8) * 8)
        if bn >= N:
            bn = N
    num_chunks = pl.cdiv(N, bn)
    needs_mask = (N % bn) != 0
    # TODO(synk): for very large H*W (single-row tile > VMEM budget) a second
    # grid axis over the flattened spatial dim would be needed; not implemented.

    if lane_dense:
        in_specs = [
            # Block width HW at block index 14 == elements [14*HW, 15*HW):
            # only the confidence channel is ever DMA'd from HBM.
            pl.BlockSpec((bn, HW), lambda i: (i, 14)),
            pl.BlockSpec((bn, HW), lambda i: (i, 14)),
        ]
    else:
        in_specs = [
            pl.BlockSpec((bn, 1, H, W), lambda i: (i, 14, 0, 0)),
            pl.BlockSpec((bn, 1, H, W), lambda i: (i, 14, 0, 0)),
        ]

    kernel = functools.partial(_confidence_loss_kernel,
                               obj_coef=float(obj_coef),
                               noobj_coef=float(noobj_coef),
                               bn=bn, n_total=N, needs_mask=needs_mask)

    tile_bytes = bn * row_bytes
    vmem_limit = min(56 * 1024 * 1024,
                     max(32 * 1024 * 1024, 4 * tile_bytes + 4 * 1024 * 1024))

    cost = pl.CostEstimate(
        flops=12 * n_elems,
        transcendentals=2 * n_elems,  # 2 tanh per element (tanh-form sigmoids)
        bytes_accessed=2 * n_elems * itemsize + num_chunks * 4,
    )

    partials = pl.pallas_call(
        kernel,
        out_shape=jax.ShapeDtypeStruct((num_chunks, 1), jnp.float32),
        grid_spec=pltpu.PrefetchScalarGridSpec(
            num_scalar_prefetch=0,
            grid=(num_chunks,),
            in_specs=in_specs,
            out_specs=pl.BlockSpec((1, 1), lambda i: (i, 0),
                                   memory_space=pltpu.SMEM),
        ),
        compiler_params=pltpu.CompilerParams(
            dimension_semantics=("parallel",),  # chunks are fully independent
            vmem_limit_bytes=vmem_limit),
        cost_estimate=cost,
    )(pred_v, tgt_v)

    return jnp.sum(partials)


if __name__ == "__main__":
    key = jax.random.PRNGKey(0)
    k1, k2, k3 = jax.random.split(key, 3)

    N, C, H, W = 2, 16, 16, 16  # NCHW, C >= 15 so channel 14 exists
    prediction = jax.random.normal(k1, (N, C, H, W), dtype=jnp.float32)
    # target confidence channel is typically in {0, 1}; other channels random
    # (they are unused by this loss).
    target = jax.random.normal(k2, (N, C, H, W), dtype=jnp.float32)
    conf = (jax.random.uniform(k3, (N, H, W)) > 0.7).astype(jnp.float32)
    target = target.at[:, 14, :, :].set(conf)

    loss = confidence_loss(prediction, target)
    jax.block_until_ready(loss)

    # Pure-JAX reference check.
    p14 = prediction[:, 14, :, :]
    t14 = target[:, 14, :, :]
    ref_obj = 5.0 * t14 * (jax.nn.sigmoid(t14) - jax.nn.sigmoid(p14)) ** 2
    ref_noobj = 0.5 * (1.0 - t14) * (t14 - p14) ** 2
    ref = ref_obj.sum() + ref_noobj.sum()

    assert jnp.allclose(loss, ref, rtol=1e-5, atol=1e-5), (loss, ref)
    print("KERNEL_OK")
</pallas_src>

<mosaic_0001>
module attributes {stable_mosaic.version = 11 : i64} {
  func.func @_confidence_loss_kernel(%arg0: i32, %arg1: memref<2x256xf32, #tpu.memory_space<vmem>>, %arg2: memref<2x256xf32, #tpu.memory_space<vmem>>, %arg3: memref<1x1xf32, #tpu.memory_space<smem>>) attributes {dimension_semantics = [#tpu.dimension_semantics<parallel>], iteration_bounds = array<i64: 1>, scalar_prefetch = 0 : i64, scratch_operands = 0 : i64, tpu.core_type = #tpu.core_type<tc>, window_params = [{transform_indices = @transform_0, window_bounds = array<i64: 2, 256>}, {transform_indices = @transform_1, window_bounds = array<i64: 2, 256>}, {transform_indices = @transform_2, window_bounds = array<i64: 1, 1>}]} {
    %c0 = arith.constant 0 : index
    %c0_0 = arith.constant 0 : index
    %0 = vector.load %arg2[%c0, %c0_0] : memref<2x256xf32, #tpu.memory_space<vmem>>, vector<2x256xf32>
    %c0_1 = arith.constant 0 : index
    %c0_2 = arith.constant 0 : index
    %1 = vector.load %arg1[%c0_1, %c0_2] : memref<2x256xf32, #tpu.memory_space<vmem>>, vector<2x256xf32>
    %cst = arith.constant 5.000000e-01 : f32
    %2 = vector.broadcast %cst : f32 to vector<2x256xf32>
    %3 = arith.mulf %2, %0 : vector<2x256xf32>
    %4 = math.tanh %3 : vector<2x256xf32>
    %cst_3 = arith.constant 5.000000e-01 : f32
    %5 = vector.broadcast %cst_3 : f32 to vector<2x256xf32>
    %6 = arith.mulf %5, %1 : vector<2x256xf32>
    %7 = math.tanh %6 : vector<2x256xf32>
    %8 = arith.subf %4, %7 : vector<2x256xf32>
    %cst_4 = arith.constant 5.000000e-01 : f32
    %9 = vector.broadcast %cst_4 : f32 to vector<2x256xf32>
    %10 = arith.mulf %9, %8 : vector<2x256xf32>
    %11 = arith.subf %0, %1 : vector<2x256xf32>
    %cst_5 = arith.constant 5.000000e+00 : f32
    %12 = vector.broadcast %cst_5 : f32 to vector<2x256xf32>
    %13 = arith.mulf %12, %0 : vector<2x256xf32>
    %14 = arith.mulf %10, %10 : vector<2x256xf32>
    %15 = arith.mulf %13, %14 : vector<2x256xf32>
    %cst_6 = arith.constant 1.000000e+00 : f32
    %16 = vector.broadcast %cst_6 : f32 to vector<2x256xf32>
    %17 = arith.subf %16, %0 : vector<2x256xf32>
    %cst_7 = arith.constant 5.000000e-01 : f32
    %18 = vector.broadcast %cst_7 : f32 to vector<2x256xf32>
    %19 = arith.mulf %18, %17 : vector<2x256xf32>
    %20 = arith.mulf %11, %11 : vector<2x256xf32>
    %21 = arith.mulf %19, %20 : vector<2x256xf32>
    %22 = arith.addf %15, %21 : vector<2x256xf32>
    %23 = vector.shape_cast %22 : vector<2x256xf32> to vector<1x2x256xf32>
    %cst_8 = arith.constant dense<0.000000e+00> : vector<1xf32>
    %24 = vector.multi_reduction <add>, %23, %cst_8 [1, 2] : vector<1x2x256xf32> to vector<1xf32>
    %25 = vector.shape_cast %24 : vector<1xf32> to vector<1x1x1xf32>
    %26 = vector.extract %25[0, 0, 0] : f32 from vector<1x1x1xf32>
    %c0_9 = arith.constant 0 : index
    %c0_10 = arith.constant 0 : index
    %27 = memref.load %arg3[%c0_9, %c0_10] : memref<1x1xf32, #tpu.memory_space<smem>>
    memref.store %26, %arg3[%c0_9, %c0_10] : memref<1x1xf32, #tpu.memory_space<smem>>
    return
  }
  func.func @transform_0(%arg0: i32) -> (i32, i32) {
    %c14_i32 = arith.constant 14 : i32
    %c0_i32 = arith.constant 0 : i32
    return %arg0, %c14_i32 : i32, i32
  }
  func.func @transform_1(%arg0: i32) -> (i32, i32) {
    %c14_i32 = arith.constant 14 : i32
    %c0_i32 = arith.constant 0 : i32
    return %arg0, %c14_i32 : i32, i32
  }
  func.func @transform_2(%arg0: i32) -> (i32, i32) {
    %c0_i32 = arith.constant 0 : i32
    %c0_i32_0 = arith.constant 0 : i32
    return %arg0, %c0_i32 : i32, i32
  }
}

</mosaic_0001>

<bundles_post_ra>
// kernel: tpu_custom_call.1
= control target key start
LH: loop header
LB: loop body
LE: loop exit
PB: predicated region body
PF: predicated region fallthrough
CT: control target
= control target key end

     0   :  { %7 = vsyncpa [#allocation3], 0  ;;  %s199_s0 = inlined_call_operand.hbm [shape: f32[2,4096], index: 0, kind: input, shape index: {}]   ;;  %s200_s1 = inlined_call_operand.hbm [shape: f32[2,4096], index: 1, kind: input, shape index: {}]   ;;  %s201_s2 = inlined_call_operand.hbm [shape: f32[1,1], index: 2, kind: output, shape index: {}]  }
   0x1   :  { %8 = vsyncpa [#allocation6], 0 }
   0x2   :  { %9 = vsyncpa [#allocation4], 0  ;;  %s14_s11 = scalar_lea.hbm %s199_s0, 56  ;;  %s172_s13 = smov [#allocation2]  }
   0x3   :  { %s16_s12 = sshll.u32 %s14_s11, 4  ;;  %s18_s14 = sshll.u32 %s172_s13, 4  ;;  %s17_s12 = int_to_ptr.hbm [resolvable:$true] %s16_s12  ;;  %s19_s14 = int_to_ptr.vmem [resolvable:$true] %s18_s14 }
   0x4   :  { %21 = dma.hbm_to_vmem [thread:$0]  %s17_s12, 64, %s19_s14, [#allocation3]  }
   0x5   :  { %s26_s17 = scalar_lea.hbm %s200_s1, 56  ;;  %s173_s19 = smov [#allocation5]  }
   0x6   :  { %s28_s18 = sshll.u32 %s26_s17, 4  ;;  %s30_s20 = sshll.u32 %s173_s19, 4  ;;  %s29_s18 = int_to_ptr.hbm [resolvable:$true] %s28_s18  ;;  %s31_s20 = int_to_ptr.vmem [resolvable:$true] %s30_s20 }
   0x7   :  { %33 = dma.hbm_to_vmem [thread:$0]  %s29_s18, 64, %s31_s20, [#allocation6]  }
   0x8   :  { %166 = dma.done.wait [#allocation3], 64  }
   0x9   :  { %167 = vsyncadd [#allocation3], 4294967232 }
   0xa   :  { %168 = dma.done.wait [#allocation6], 64  }
   0xb   :  { %169 = vsyncadd [#allocation6], 4294967232  ;;  %v42_v0 = vld [vmem:[#allocation5] sm:$0xf]  ;;  %v43_v1 = vld [vmem:[#allocation2] sm:$0xf] }
   0xc   :  { %v44_v2 = vmul.f32 0.5, %v42_v0  ;;  %v46_v3 = vmul.f32 0.5, %v43_v1  ;;  %v50_v4 = vsub.f32 %v42_v0, %v43_v1  ;;  %v54_v5 = vsub.f32 1.0, %v42_v0  ;;  %s85_s21 = sshll.u32 %s201_s2, 4  ;;  %s174_s23 = smov [#allocation7]   ;;  %s86_s21 = int_to_ptr.hbm [resolvable:$true] %s85_s21 }
   0xd   :  { %v51_v12 = vmul.f32 5.0, %v42_v0  ;;  %vm65_vm0 = vcmask 1041408  }
   0xe   :  { %102 = vtanh.f32 %v44_v2  ;;  %v55_v9 = vmul.f32 0.5, %v54_v5  ;;  %v56_v10 = vmul.f32 %v50_v4, %v50_v4 }
   0xf   :  { %104 = vtanh.f32 %v46_v3 }
  0x10   :  { %v57_v14 = vmul.f32 %v56_v10, %v55_v9 }
  0x14   :  { %v103_v6 = vpop.eup %102 }
  0x15   :  { %v105_v7 = vpop.eup %104 }
  0x16   :  { %v48_v8 = vsub.f32 %v103_v6, %v105_v7 }
  0x18   :  { %v49_v11 = vmul.f32 0.5, %v48_v8 }
  0x1a   :  { %v52_v13 = vmul.f32 %v49_v11, %v49_v11 }
  0x1c   :  { %v53_v15 = vmul.f32 %v52_v13, %v51_v12 }
  0x1e   :  { %v58_v16 = vadd.f32 %v57_v14, %v53_v15 }
  0x20   :  { %60 = vst [vmem:[#allocation1] ss:$4 sm:$0xff] %v58_v16 }
  0x27   :  { %v61_v17 = vld.sshfl [vmem:[#allocation1] sm:$0xff pattern:$0x73625140]  ;;  %v62_v18 = vld.sshfl [vmem:[#allocation1 + $0x8] sm:$0xff pattern:$0x73625140] }
  0x28   :  { %v66_v19 = vsel %vm65_vm0, %v61_v17, 0.0  ;;  %v67_v20 = vsel %vm65_vm0, %v62_v18, 0.0 }
  0x29   :  { %v68_v21 = vadd.f32 %v67_v20, %v66_v19 }
  0x2b   :  { %69 = vadd.xlane.f32.xlu0 %v68_v21 }
  0x9e   :  { %v70_v22 = vpop.xlane.xlu0 %69 }
  0x9f   :  { %v71_v23 = vrot.slane %v70_v22, 4 }
  0xa1   :  { %v72_v24 = vadd.f32 %v71_v23, %v70_v22 }
  0xa3   :  { %v73_v25 = vrot.slane %v72_v24, 2 }
  0xa5   :  { %v74_v26 = vadd.f32 %v73_v25, %v72_v24 }
  0xa7   :  { %v75_v27 = vrot.slane %v74_v26, 1 }
  0xa9   :  { %v76_v28 = vadd.f32 %v75_v27, %v74_v26 }
  0xab   :  { %97 = vpush %v76_v28 }
  0xdc   :  { %s98_s22 = spop %97 }
  0xdd   :  { %79 = sst [smem:[#allocation7]] %s98_s22 }
  0xde   :  { %88 = dma.smem_to_hbm %s174_s23, 16, %s86_s21, [#allocation4]  }
  0xdf   :  { %170 = dma.done.wait [#allocation4], 16  }
  0xe0   :  { %171 = vsyncadd [#allocation4], 4294967280 }
  0xe1   :  { %93 = sfence }
  0xe2   :  { %94 = vsyncpa [#allocation3], 1 }
  0xe3   :  { %95 = vsyncpa [#allocation6], 1 }
  0xe4   :  { %96 = vsyncpa [#allocation4], 1 }

</bundles_post_ra>
